<compile_context>
chip_gen: v7x
topology: tpu7x:2x2x1
jax: 0.10.0
libtpu: 0.0.40
codegen_flags: <defaults>
</compile_context>

<pallas_src>
import functools

import jax
import jax.numpy as jnp
from jax.experimental import pallas as pl
from jax.experimental.pallas import tpu as pltpu


_TILE_V_PREF = 4096          # vocab chunk (multiple of 128)
_MAX_TILE_ROWS = 256


def _ce_kernel(logits_ref, labels_ref, out_ref,
               m_ref, s_ref, lab_ref, acc_ref, *,
               n_rows, vocab, tile_rows, tile_v, inner_tiles):
    """One grid step: online-LSE update for a (tile_rows, tile_v) logits chunk."""
    p = pl.program_id(0)        # parallel slice (megacore on v7x)
    i = pl.program_id(1)        # row-tile index within the slice
    v = pl.program_id(2)        # vocab chunk index
    nv = pl.num_programs(2)

    # Loss accumulator persists across the whole slice.
    @pl.when(jnp.logical_and(i == 0, v == 0))
    def _():
        acc_ref[...] = jnp.zeros_like(acc_ref)

    # Per-row online-softmax state resets at the start of every row tile.
    @pl.when(v == 0)
    def _():
        m_ref[...] = jnp.full(m_ref.shape, -jnp.inf, dtype=jnp.float32)
        s_ref[...] = jnp.zeros_like(s_ref)
        lab_ref[...] = jnp.zeros_like(lab_ref)

    x = logits_ref[...].astype(jnp.float32)          # (T, tile_v) bounded chunk
    labels = labels_ref[...]                         # (T, 1) int32

    # Chunk-local lane ids; compare against the chunk-local label index
    # (labels - chunk base) rather than adding the base to the whole iota.
    lane_ids = jax.lax.broadcasted_iota(jnp.int32, x.shape, 1)
    labels_local = labels - v * tile_v

    if vocab % tile_v != 0:
        # Mask padded lanes of the (ragged) final vocab chunk.  Restrictive
        # only on the last chunk; elsewhere the bound is >= tile_v.
        x = jnp.where(lane_ids < (vocab - v * tile_v), x, -jnp.inf)

    # Online log-sum-exp update.
    m_old = m_ref[...]
    m_new = jnp.maximum(m_old, jnp.max(x, axis=-1, keepdims=True))
    scale = jnp.exp(m_old - m_new)                   # 0 on the first chunk
    s_ref[...] = s_ref[...] * scale + jnp.sum(jnp.exp(x - m_new),
                                              axis=-1, keepdims=True)
    m_ref[...] = m_new

    # Logit at the label index (absolute; the label lands in exactly one
    # chunk).  Same resident x vregs as the exp pass — no extra pass.
    lab_ref[...] += jnp.sum(jnp.where(lane_ids == labels_local, x, 0.0),
                            axis=-1, keepdims=True)

    @pl.when(v == nv - 1)
    def _():
        # Intended global row ids for this tile (masks ragged / duplicated
        # edge tiles); use `where` so garbage rows can never poison the sum
        # through NaN/Inf.
        row_base = (p * inner_tiles + i) * tile_rows
        row_ids = jax.lax.broadcasted_iota(jnp.int32, (tile_rows, 1), 0) + row_base
        in_range = row_ids < n_rows

        lse = jnp.log(s_ref[...]) + m_ref[...]
        per_token = lse - lab_ref[...]
        valid = jnp.logical_and(labels != 0, in_range)
        acc_ref[...] += jnp.where(valid, per_token, 0.0)

    @pl.when(jnp.logical_and(i == pl.num_programs(1) - 1, v == nv - 1))
    def _():
        # Lane-dense (8, 128) output block per parallel slice; only [0,0] read.
        s = jnp.sum(acc_ref[...])
        out_ref[...] = jnp.broadcast_to(s, out_ref.shape).astype(jnp.float32)


def _vmem_capacity_bytes():
    try:
        return int(pltpu.get_tpu_info().vmem_capacity_bytes)
    except Exception:
        return 64 * 1024 * 1024          # conservative (v7x per-TC)


def _pick_tiles(n_rows, vocab, itemsize, budget, tile_v=None):
    """Row/vocab tile sizes fitting a per-generation VMEM budget."""
    if tile_v is None:
        tile_v = _TILE_V_PREF
    if tile_v >= vocab:
        tile_v = vocab                    # full dim: always a legal block
    else:
        assert tile_v % 128 == 0, "vocab chunk must be a multiple of 128"

    # Per-element footprint: double-buffered input chunk + f32 working copy
    # + exp / compare temps.
    per_elem = 2 * itemsize + 16
    rows = budget // max(1, tile_v * per_elem)
    rows = int(max(8, min(_MAX_TILE_ROWS, (rows // 8) * 8)))

    if n_rows < 8:
        tile_rows = n_rows                # full dim: legal block
    else:
        tile_rows = min(rows, (n_rows // 8) * 8)
    return tile_rows, tile_v


def gpt_lm_loss(logits, labels, *, tile_v=None):
    """CrossEntropyLoss(ignore_index=0) on next-token-shifted logits/labels.

    logits: [B, S, V] float, labels: [B, S] int.
    Returns scalar f32 mean over non-ignored tokens (NaN if none — matches torch).
    """
    B, S, V = logits.shape
    n_rows = B * S

    # Free, contiguous reshape — no extra HBM traffic for the logits.
    flat_logits = logits.reshape(n_rows, V)

    # Shift only the labels: position (b, t) predicts labels[b, t+1]; the last
    # position of every sequence gets 0 == ignore_index (implements `:-1`).
    shifted = jnp.pad(labels[:, 1:].astype(jnp.int32), ((0, 0), (0, 1)))
    flat_labels = shifted.reshape(n_rows, 1)

    vmem_cap = _vmem_capacity_bytes()
    tile_budget = min(48 * 1024 * 1024, int(vmem_cap * 0.4))
    vmem_limit = max(32 * 1024 * 1024, min(int(vmem_cap * 0.75), 100 * 1024 * 1024))

    itemsize = jnp.dtype(logits.dtype).itemsize
    tile_rows, tv = _pick_tiles(n_rows, V, itemsize, tile_budget, tile_v)

    total_row_tiles = pl.cdiv(n_rows, tile_rows)
    v_tiles = pl.cdiv(V, tv)
    n_parallel = 2 if total_row_tiles >= 2 else 1     # both TCs on v7x
    inner_tiles = pl.cdiv(total_row_tiles, n_parallel)

    def row_block(p, i, v):
        # Clamp so an (p, i) past the end re-reads the last tile; those rows
        # are masked out in-kernel via the un-clamped intended row ids.
        return (jnp.minimum(p * inner_tiles + i, total_row_tiles - 1), v)

    def lab_block(p, i, v):
        return (jnp.minimum(p * inner_tiles + i, total_row_tiles - 1), 0)

    kernel = functools.partial(
        _ce_kernel, n_rows=n_rows, vocab=V,
        tile_rows=tile_rows, tile_v=tv, inner_tiles=inner_tiles)

    partials = pl.pallas_call(
        kernel,
        out_shape=jax.ShapeDtypeStruct((n_parallel, 8, 128), jnp.float32),
        grid_spec=pltpu.PrefetchScalarGridSpec(
            num_scalar_prefetch=0,
            grid=(n_parallel, inner_tiles, v_tiles),
            in_specs=[
                pl.BlockSpec((tile_rows, tv), row_block),
                pl.BlockSpec((tile_rows, 1), lab_block),
            ],
            out_specs=pl.BlockSpec((1, 8, 128), lambda p, i, v: (p, 0, 0)),
            scratch_shapes=[
                pltpu.VMEM((tile_rows, 1), jnp.float32),   # running max m
                pltpu.VMEM((tile_rows, 1), jnp.float32),   # running sum-exp
                pltpu.VMEM((tile_rows, 1), jnp.float32),   # label logit
                pltpu.VMEM((tile_rows, 1), jnp.float32),   # loss accumulator
            ],
        ),
        compiler_params=pltpu.CompilerParams(
            dimension_semantics=("parallel", "arbitrary", "arbitrary"),
            vmem_limit_bytes=vmem_limit,
        ),
    )(flat_logits, flat_labels)

    loss_sum = jnp.sum(partials[:, 0, 0])
    # Valid-token count from the tiny labels array — plain JAX, negligible cost.
    valid_cnt = jnp.sum((flat_labels != 0).astype(jnp.float32))
    # NaN if every token is ignored (0/0) — matches torch.nn.CrossEntropyLoss.
    return (loss_sum / valid_cnt).astype(jnp.float32)


def _reference(logits, labels):
    """Pure-JAX reference matching torch CrossEntropyLoss(ignore_index=0)."""
    B, S, V = logits.shape
    sl = logits[:, :-1, :].reshape(-1, V).astype(jnp.float32)
    tl = labels[:, 1:].reshape(-1)
    logp = jax.nn.log_softmax(sl, axis=-1)
    nll = -jnp.take_along_axis(logp, tl[:, None], axis=-1)[:, 0]
    valid = (tl != 0).astype(jnp.float32)
    return jnp.sum(nll * valid) / jnp.sum(valid)


if __name__ == "__main__":
    key = jax.random.PRNGKey(0)
    k1, k2, k3, k4 = jax.random.split(key, 4)

    # Test 1: f32 logits, lane-aligned vocab, single vocab chunk.
    B, S, V = 2, 9, 128
    logits = jax.random.normal(k1, (B, S, V), dtype=jnp.float32)
    labels = jax.random.randint(k2, (B, S), 0, V, dtype=jnp.int32)
    labels = labels.at[0, 3].set(0).at[1, 5].set(0)   # exercise ignore_index=0
    loss = gpt_lm_loss(logits, labels)
    jax.block_until_ready(loss)
    ref = _reference(logits, labels)
    assert jnp.allclose(loss, ref, rtol=1e-5, atol=1e-5), (loss, ref)

    # Test 2: non-128-multiple vocab with forced V-chunking — exercises the
    # online log-sum-exp, the padded-lane mask, and the ragged last row tile.
    B2, S2, V2 = 2, 5, 300
    logits2 = jax.random.normal(k3, (B2, S2, V2), dtype=jnp.float32)
    labels2 = jax.random.randint(k4, (B2, S2), 0, V2, dtype=jnp.int32)
    loss2 = gpt_lm_loss(logits2, labels2, tile_v=128)
    jax.block_until_ready(loss2)
    ref2 = _reference(logits2, labels2)
    assert jnp.allclose(loss2, ref2, rtol=1e-5, atol=1e-5), (loss2, ref2)

    # Test 3: bf16 logits (per-chunk f32 upcast path).
    logits3 = logits.astype(jnp.bfloat16)
    loss3 = gpt_lm_loss(logits3, labels)
    jax.block_until_ready(loss3)
    ref3 = _reference(logits3, labels)
    assert jnp.allclose(loss3, ref3, rtol=1e-4, atol=1e-4), (loss3, ref3)

    print("KERNEL_OK")
</pallas_src>

<mosaic_0001>
module attributes {stable_mosaic.version = 11 : i64} {
  func.func @_ce_kernel(%arg0: i32, %arg1: i32, %arg2: i32, %arg3: memref<16x128xf32, #tpu.memory_space<vmem>>, %arg4: memref<16x1xi32, #tpu.memory_space<vmem>>, %arg5: memref<1x8x128xf32, #tpu.memory_space<vmem>>, %arg6: memref<16x1xf32, #tpu.memory_space<vmem>>, %arg7: memref<16x1xf32, #tpu.memory_space<vmem>>, %arg8: memref<16x1xf32, #tpu.memory_space<vmem>>, %arg9: memref<16x1xf32, #tpu.memory_space<vmem>>) attributes {dimension_semantics = [#tpu.dimension_semantics<parallel>, #tpu.dimension_semantics<arbitrary>, #tpu.dimension_semantics<arbitrary>], iteration_bounds = array<i64: 2, 1, 1>, scalar_prefetch = 0 : i64, scratch_operands = 4 : i64, tpu.core_type = #tpu.core_type<tc>, window_params = [{transform_indices = @transform_0, window_bounds = array<i64: 16, 128>}, {transform_indices = @transform_1, window_bounds = array<i64: 16, 1>}, {transform_indices = @transform_2, window_bounds = array<i64: 1, 8, 128>}]} {
    %c0_i32 = arith.constant 0 : i32
    %0 = arith.cmpi eq, %arg1, %c0_i32 : i32
    %c0_i32_0 = arith.constant 0 : i32
    %1 = arith.cmpi eq, %arg2, %c0_i32_0 : i32
    %2 = arith.andi %0, %1 : i1
    %3 = arith.extui %2 : i1 to i32
    %c0_i32_1 = arith.constant 0 : i32
    %4 = arith.cmpi ne, %3, %c0_i32_1 : i32
    scf.if %4 {
      %cst_27 = arith.constant 0.000000e+00 : f32
      %47 = vector.broadcast %cst_27 : f32 to vector<16x1xf32>
      %c0_28 = arith.constant 0 : index
      %c0_29 = arith.constant 0 : index
      %48 = vector.load %arg9[%c0_28, %c0_29] : memref<16x1xf32, #tpu.memory_space<vmem>>, vector<16x1xf32>
      tpu.vector_store %arg9[%c0_28, %c0_29], %47 {strides = array<i32>} : memref<16x1xf32, #tpu.memory_space<vmem>>, vector<16x1xf32>,
    } else {
    }
    %c0_i32_2 = arith.constant 0 : i32
    %5 = arith.cmpi eq, %arg2, %c0_i32_2 : i32
    %6 = arith.extui %5 : i1 to i32
    %c0_i32_3 = arith.constant 0 : i32
    %7 = arith.cmpi ne, %6, %c0_i32_3 : i32
    scf.if %7 {
      %cst_27 = arith.constant 0xFF800000 : f32
      %47 = vector.broadcast %cst_27 : f32 to vector<16x1xf32>
      %c0_28 = arith.constant 0 : index
      %c0_29 = arith.constant 0 : index
      %48 = vector.load %arg6[%c0_28, %c0_29] : memref<16x1xf32, #tpu.memory_space<vmem>>, vector<16x1xf32>
      tpu.vector_store %arg6[%c0_28, %c0_29], %47 {strides = array<i32>} : memref<16x1xf32, #tpu.memory_space<vmem>>, vector<16x1xf32>,
      %cst_30 = arith.constant 0.000000e+00 : f32
      %49 = vector.broadcast %cst_30 : f32 to vector<16x1xf32>
      %c0_31 = arith.constant 0 : index
      %c0_32 = arith.constant 0 : index
      %50 = vector.load %arg7[%c0_31, %c0_32] : memref<16x1xf32, #tpu.memory_space<vmem>>, vector<16x1xf32>
      tpu.vector_store %arg7[%c0_31, %c0_32], %49 {strides = array<i32>} : memref<16x1xf32, #tpu.memory_space<vmem>>, vector<16x1xf32>,
      %cst_33 = arith.constant 0.000000e+00 : f32
      %51 = vector.broadcast %cst_33 : f32 to vector<16x1xf32>
      %c0_34 = arith.constant 0 : index
      %c0_35 = arith.constant 0 : index
      %52 = vector.load %arg8[%c0_34, %c0_35] : memref<16x1xf32, #tpu.memory_space<vmem>>, vector<16x1xf32>
      tpu.vector_store %arg8[%c0_34, %c0_35], %51 {strides = array<i32>} : memref<16x1xf32, #tpu.memory_space<vmem>>, vector<16x1xf32>,
    } else {
    }
    %c0 = arith.constant 0 : index
    %c0_4 = arith.constant 0 : index
    %8 = vector.load %arg3[%c0, %c0_4] : memref<16x128xf32, #tpu.memory_space<vmem>>, vector<16x128xf32>
    %c0_5 = arith.constant 0 : index
    %c0_6 = arith.constant 0 : index
    %9 = vector.load %arg4[%c0_5, %c0_6] : memref<16x1xi32, #tpu.memory_space<vmem>>, vector<16x1xi32>
    %10 = tpu.iota {dimensions = array<i32: 1>} : vector<16x128xi32>
    %c128_i32 = arith.constant 128 : i32
    %11 = arith.muli %arg2, %c128_i32 : i32
    %12 = vector.broadcast %11 : i32 to vector<16x1xi32>
    %13 = arith.subi %9, %12 : vector<16x1xi32>
    %c0_7 = arith.constant 0 : index
    %c0_8 = arith.constant 0 : index
    %14 = vector.load %arg6[%c0_7, %c0_8] : memref<16x1xf32, #tpu.memory_space<vmem>>, vector<16x1xf32>
    %cst = arith.constant dense<0xFF800000> : vector<16xf32>
    %15 = vector.multi_reduction <maximumf>, %8, %cst [1] : vector<16x128xf32> to vector<16xf32>
    %16 = vector.shape_cast %15 : vector<16xf32> to vector<16x1xf32>
    %17 = arith.maximumf %14, %16 : vector<16x1xf32>
    %18 = arith.subf %14, %17 : vector<16x1xf32>
    %19 = math.exp %18 : vector<16x1xf32>
    %c0_9 = arith.constant 0 : index
    %c0_10 = arith.constant 0 : index
    %20 = vector.load %arg7[%c0_9, %c0_10] : memref<16x1xf32, #tpu.memory_space<vmem>>, vector<16x1xf32>
    %21 = arith.mulf %20, %19 : vector<16x1xf32>
    %22 = vector.broadcast %17 : vector<16x1xf32> to vector<16x128xf32>
    %23 = arith.subf %8, %22 : vector<16x128xf32>
    %24 = math.exp %23 : vector<16x128xf32>
    %cst_11 = arith.constant dense<0.000000e+00> : vector<16xf32>
    %25 = vector.multi_reduction <add>, %24, %cst_11 [1] : vector<16x128xf32> to vector<16xf32>
    %26 = vector.shape_cast %25 : vector<16xf32> to vector<16x1xf32>
    %27 = arith.addf %21, %26 : vector<16x1xf32>
    %c0_12 = arith.constant 0 : index
    %c0_13 = arith.constant 0 : index
    %28 = vector.load %arg7[%c0_12, %c0_13] : memref<16x1xf32, #tpu.memory_space<vmem>>, vector<16x1xf32>
    tpu.vector_store %arg7[%c0_12, %c0_13], %27 {strides = array<i32>} : memref<16x1xf32, #tpu.memory_space<vmem>>, vector<16x1xf32>,
    %c0_14 = arith.constant 0 : index
    %c0_15 = arith.constant 0 : index
    %29 = vector.load %arg6[%c0_14, %c0_15] : memref<16x1xf32, #tpu.memory_space<vmem>>, vector<16x1xf32>
    tpu.vector_store %arg6[%c0_14, %c0_15], %17 {strides = array<i32>} : memref<16x1xf32, #tpu.memory_space<vmem>>, vector<16x1xf32>,
    %c0_16 = arith.constant 0 : index
    %c0_17 = arith.constant 0 : index
    %30 = vector.load %arg8[%c0_16, %c0_17] : memref<16x1xf32, #tpu.memory_space<vmem>>, vector<16x1xf32>
    %31 = vector.broadcast %13 : vector<16x1xi32> to vector<16x128xi32>
    %32 = arith.cmpi eq, %10, %31 : vector<16x128xi32>
    %cst_18 = arith.constant 0.000000e+00 : f32
    %33 = vector.broadcast %cst_18 : f32 to vector<16x128xf32>
    %34 = arith.select %32, %8, %33 : vector<16x128xi1>, vector<16x128xf32>
    %cst_19 = arith.constant dense<0.000000e+00> : vector<16xf32>
    %35 = vector.multi_reduction <add>, %34, %cst_19 [1] : vector<16x128xf32> to vector<16xf32>
    %36 = vector.shape_cast %35 : vector<16xf32> to vector<16x1xf32>
    %37 = arith.addf %30, %36 : vector<16x1xf32>
    %c0_20 = arith.constant 0 : index
    %c0_21 = arith.constant 0 : index
    %38 = vector.load %arg8[%c0_20, %c0_21] : memref<16x1xf32, #tpu.memory_space<vmem>>, vector<16x1xf32>
    tpu.vector_store %arg8[%c0_20, %c0_21], %37 {strides = array<i32>} : memref<16x1xf32, #tpu.memory_space<vmem>>, vector<16x1xf32>,
    %c0_i32_22 = arith.constant 0 : i32
    %39 = arith.cmpi eq, %arg2, %c0_i32_22 : i32
    %40 = arith.extui %39 : i1 to i32
    %c0_i32_23 = arith.constant 0 : i32
    %41 = arith.cmpi ne, %40, %c0_i32_23 : i32
    scf.if %41 {
      %c1_i32 = arith.constant 1 : i32
      %47 = arith.muli %arg0, %c1_i32 : i32
      %48 = arith.addi %47, %arg1 : i32
      %c16_i32 = arith.constant 16 : i32
      %49 = arith.muli %48, %c16_i32 : i32
      %50 = tpu.iota {dimensions = array<i32: 0>} : vector<16x1xi32>
      %51 = vector.broadcast %49 : i32 to vector<16x1xi32>
      %52 = arith.addi %50, %51 : vector<16x1xi32>
      %c18_i32 = arith.constant 18 : i32
      %53 = vector.broadcast %c18_i32 : i32 to vector<16x1xi32>
      %54 = arith.cmpi slt, %52, %53 : vector<16x1xi32>
      %c0_27 = arith.constant 0 : index
      %c0_28 = arith.constant 0 : index
      %55 = vector.load %arg7[%c0_27, %c0_28] : memref<16x1xf32, #tpu.memory_space<vmem>>, vector<16x1xf32>
      %56 = math.log %55 : vector<16x1xf32>
      %c0_29 = arith.constant 0 : index
      %c0_30 = arith.constant 0 : index
      %57 = vector.load %arg6[%c0_29, %c0_30] : memref<16x1xf32, #tpu.memory_space<vmem>>, vector<16x1xf32>
      %58 = arith.addf %56, %57 : vector<16x1xf32>
      %c0_31 = arith.constant 0 : index
      %c0_32 = arith.constant 0 : index
      %59 = vector.load %arg8[%c0_31, %c0_32] : memref<16x1xf32, #tpu.memory_space<vmem>>, vector<16x1xf32>
      %60 = arith.subf %58, %59 : vector<16x1xf32>
      %c0_i32_33 = arith.constant 0 : i32
      %61 = vector.broadcast %c0_i32_33 : i32 to vector<16x1xi32>
      %62 = arith.cmpi ne, %9, %61 : vector<16x1xi32>
      %63 = arith.andi %62, %54 : vector<16x1xi1>
      %c0_34 = arith.constant 0 : index
      %c0_35 = arith.constant 0 : index
      %64 = vector.load %arg9[%c0_34, %c0_35] : memref<16x1xf32, #tpu.memory_space<vmem>>, vector<16x1xf32>
      %cst_36 = arith.constant 0.000000e+00 : f32
      %65 = vector.broadcast %cst_36 : f32 to vector<16x1xf32>
      %66 = arith.select %63, %60, %65 : vector<16x1xi1>, vector<16x1xf32>
      %67 = arith.addf %64, %66 : vector<16x1xf32>
      %c0_37 = arith.constant 0 : index
      %c0_38 = arith.constant 0 : index
      %68 = vector.load %arg9[%c0_37, %c0_38] : memref<16x1xf32, #tpu.memory_space<vmem>>, vector<16x1xf32>
      tpu.vector_store %arg9[%c0_37, %c0_38], %67 {strides = array<i32>} : memref<16x1xf32, #tpu.memory_space<vmem>>, vector<16x1xf32>,
    } else {
    }
    %c0_i32_24 = arith.constant 0 : i32
    %42 = arith.cmpi eq, %arg1, %c0_i32_24 : i32
    %c0_i32_25 = arith.constant 0 : i32
    %43 = arith.cmpi eq, %arg2, %c0_i32_25 : i32
    %44 = arith.andi %42, %43 : i1
    %45 = arith.extui %44 : i1 to i32
    %c0_i32_26 = arith.constant 0 : i32
    %46 = arith.cmpi ne, %45, %c0_i32_26 : i32
    scf.if %46 {
      %c0_27 = arith.constant 0 : index
      %c0_28 = arith.constant 0 : index
      %47 = vector.load %arg9[%c0_27, %c0_28] : memref<16x1xf32, #tpu.memory_space<vmem>>, vector<16x1xf32>
      %48 = vector.shape_cast %47 : vector<16x1xf32> to vector<1x16x1xf32>
      %cst_29 = arith.constant dense<0.000000e+00> : vector<1xf32>
      %49 = vector.multi_reduction <add>, %48, %cst_29 [1, 2] : vector<1x16x1xf32> to vector<1xf32>
      %50 = vector.shape_cast %49 : vector<1xf32> to vector<1x1x1xf32>
      %51 = vector.extract %50[0, 0, 0] : f32 from vector<1x1x1xf32>
      %52 = vector.broadcast %51 : f32 to vector<1x8x128xf32>
      %c0_30 = arith.constant 0 : index
      %c0_31 = arith.constant 0 : index
      %c0_32 = arith.constant 0 : index
      %53 = vector.load %arg5[%c0_30, %c0_31, %c0_32] : memref<1x8x128xf32, #tpu.memory_space<vmem>>, vector<1x8x128xf32>
      tpu.vector_store %arg5[%c0_30, %c0_31, %c0_32], %52 {strides = array<i32>} : memref<1x8x128xf32, #tpu.memory_space<vmem>>, vector<1x8x128xf32>,
    } else {
    }
    return
  }
  func.func @transform_0(%arg0: i32, %arg1: i32, %arg2: i32) -> (i32, i32) {
    %c1_i32 = arith.constant 1 : i32
    %0 = arith.muli %arg0, %c1_i32 : i32
    %1 = arith.addi %0, %arg1 : i32
    %c1_i32_0 = arith.constant 1 : i32
    %2 = arith.minsi %1, %c1_i32_0 : i32
    %c0_i32 = arith.constant 0 : i32
    return %2, %arg2 : i32, i32
  }
  func.func @transform_1(%arg0: i32, %arg1: i32, %arg2: i32) -> (i32, i32) {
    %c1_i32 = arith.constant 1 : i32
    %0 = arith.muli %arg0, %c1_i32 : i32
    %1 = arith.addi %0, %arg1 : i32
    %c1_i32_0 = arith.constant 1 : i32
    %2 = arith.minsi %1, %c1_i32_0 : i32
    %c0_i32 = arith.constant 0 : i32
    %c0_i32_1 = arith.constant 0 : i32
    return %2, %c0_i32 : i32, i32
  }
  func.func @transform_2(%arg0: i32, %arg1: i32, %arg2: i32) -> (i32, i32, i32) {
    %c0_i32 = arith.constant 0 : i32
    %c0_i32_0 = arith.constant 0 : i32
    %c0_i32_1 = arith.constant 0 : i32
    return %arg0, %c0_i32, %c0_i32_0 : i32, i32, i32
  }
}

</mosaic_0001>

<bundles_post_ra>
// kernel: tpu_custom_call.1
= control target key start
LH: loop header
LB: loop body
LE: loop exit
PB: predicated region body
PF: predicated region fallthrough
CT: control target
= control target key end

     0   :  { %7 = vsyncpa [#allocation7], 0  ;;  %s858_s0 = inlined_call_operand.vmem [shape: f32[18,128], index: 0, kind: input, shape index: {}]   ;;  %s859_s1 = inlined_call_operand.vmem [shape: s32[18,1], index: 1, kind: input, shape index: {}]   ;;  %s860_s2 = inlined_call_operand.hbm [shape: f32[2,8,128], index: 2, kind: output, shape index: {}]  }
   0x1   :  { %9 = vsyncpa [#allocation7 + $0x1], 0  ;;  %s716_s9 = smov 0   ;;  %s718_s10 = smov 0  }
   0x2   :  { %s720_s11 = smov 0   ;;  %s722_s12 = smov 0  }
   0x3   :  { %s724_s13 = smov 0   ;;  %s726_s14 = smov 0  }
   0x4 LB: > { %s528_s15 = sadd.s32 4294967295, %s695_s14   ;;  %s529_s16 = sadd.s32 4294967294, %s695_s14   ;;  %s695_s14 = sphi %s726_s14, %s15_s14   ;;  %s691_s13 = sphi %s724_s13, %s867_s13   ;;  %s687_s12 = sphi %s722_s12, %s866_s12   ;;  %s683_s11 = sphi %s720_s11, %s865_s11   ;;  %s679_s10 = sphi %s718_s10, %s864_s10   ;;  %s675_s9 = sphi %s716_s9, %s863_s9  }
   0x5   : > { %s34_s17 = sadd.s32 1, %s691_s13  ;;  %s107_s18 = sadd.s32 1, %s683_s11 }
   0x6   : > { %p36_p0 = scmp.ge.s32.totalorder %s34_s17, 2  ;;  %p117_p1 = scmp.ne.s32.totalorder %s683_s11, %s679_s10 }
   0x7   : > { %p118_p2 = scmp.eq.s32.totalorder %s528_s15, 1  ;;  %p123_p3 = scmp.ne.s32.totalorder %s679_s10, %s675_s9 }
   0x8   : > { %s869_s17 = smov (%p36_p0, %s34_s17), 0  ;;  %p124_p5 = scmp.eq.s32.totalorder %s529_s16, 1 }
   0x9   : > { %p756_p4 = por %p118_p2, %p117_p1  ;;  %s104_s20 = ssub.s32 %s691_s13, %s869_s17 }
   0xa   : > { %p532_p6 = scmp.ge.s32.totalorder %s695_s14, 1  ;;  %p105_p7 = scmp.eq.s32.totalorder %s104_s20, 0 }
   0xb   : > { %p763_p8 = por %p124_p5, %p123_p3  ;;  %p191_p9 = scmp.lt.s32.totalorder %s695_s14, 3 }
   0xc   : > { %s769_s22 = scalar_select %p105_p7, %s683_s11, %s107_s18  }
   0xd   : > { %p192_p10 = pnand %p532_p6, %p191_p9 }
   0xe   : > { %p236_p11 = scmp.lt.s32.totalorder (!%p192_p10), %s687_s12, 1  ;;  %vm284_vm0 = vcmask (!%p192_p10), 7168   ;;  %v697_v0 = vmov (!%p192_p10), -inf   ;;  %v698_v3 = vmov (!%p192_p10), 0   ;;  %v699_v4 = vmov (!%p192_p10), 0.0   ;;  %s538_s4 = sshll.u32 (!%p192_p10), %s687_s12, 4 }
   0xf   : > { %195 = sbr.rel (%p192_p10) target bundleno = 724 (0x2d4), region = 28  ;;  %291 = vst.msk [vmem:[#allocation2] sm:$0xff] (!%p192_p10), %vm284_vm0, %v697_v0  ;;  %292 = vst.msk [vmem:[#allocation2 + $0x8] sm:$0xff] (!%p192_p10), %vm284_vm0, %v697_v0  ;;  %603 = vset.pattern.permute.xlu1 (!%p192_p10), %v698_v3  ;;  %604 = vset.pattern.permute.xlu0 (!%p192_p10), %v698_v3  ;;  %v301_v15 = vlaneseq (!%p192_p10)  ;;  %v380_v50 = vstv (!%p192_p10), %s538_s4  ;;  %s232_s5 = sand.u32 (!%p192_p10), 1, %s679_s10  }
  0x10   : > { %285 = vst.msk [vmem:[#allocation5] sm:$0xff] (!%p192_p10), %vm284_vm0, %v699_v4  ;;  %286 = vst.msk [vmem:[#allocation5 + $0x8] sm:$0xff] (!%p192_p10), %vm284_vm0, %v699_v4  ;;  %s533_s6 = sshll.u32 (!%p192_p10), %s232_s5, 3  ;;  %s540_s15 = sshll.u32 (!%p192_p10), %s687_s12, 7 }
  0x11   : > { %293 = vst.msk [vmem:[#allocation3] sm:$0xff] (!%p192_p10), %vm284_vm0, %v699_v4  ;;  %294 = vst.msk [vmem:[#allocation3 + $0x8] sm:$0xff] (!%p192_p10), %vm284_vm0, %v699_v4  ;;  %v302_v16 = vand.u32 (!%p192_p10), 127, %v301_v15  ;;  %v378_v48 = vshrl.u32 (!%p192_p10), %v301_v15, 7  ;;  %s234_s7 = scalar_lea.vmem (!%p192_p10), [#allocation6], %s533_s6 }
  0x12   : > { %295 = vst.msk [vmem:[#allocation4] sm:$0xff] (!%p192_p10), %vm284_vm0, %v699_v4  ;;  %296 = vst.msk [vmem:[#allocation4 + $0x8] sm:$0xff] (!%p192_p10), %vm284_vm0, %v699_v4  ;;  %s443_s8 = sshll.u32 (!%p192_p10), %s234_s7, 4  ;;  %s808_s8 = int_to_ptr.vmem [resolvable:$true] %s443_s8 }
  0x13   : > { %v379_v51 = vadd.s32 (!%p192_p10), 8, %v378_v48  ;;  %v381_v52 = vadd.s32 (!%p192_p10), %v380_v50, %v378_v48 }
  0x15   : > { %v382_v54 = vadd.s32 (!%p192_p10), %v380_v50, %v379_v51  ;;  %vm383_vm3 = vcmp.lt.s32.totalorder (!%p192_p10), %v381_v52, 18 }
  0x16   : > { %s237_s23 = scalar_select %p236_p11, %s687_s12, 1  ;;  %v307_v6 = vld [vmem:[#allocation2] sm:$0xff]  ;;  %v308_v9 = vld [vmem:[#allocation2 + $0x8] sm:$0xff] }
  0x17   : > { %vm384_vm6 = vcmp.lt.s32.totalorder %v382_v54, 18  ;;  %v403_v62 = vld [vmem:[#allocation5] sm:$0xff]  ;;  %s700_s12 = smov [#allocation6]  }
  0x18   : > { %s534_s24 = sshll.u32 %s237_s23, 1  ;;  %v321_v35 = vld [vmem:[#allocation3] sm:$0xff]  ;;  %v322_v39 = vld [vmem:[#allocation3 + $0x8] sm:$0xff]  ;;  %s813_s23 = scalar_lea.hbm %s860_s2, %s540_s15 }
  0x19   : > { %p243_p12 = scmp.lt.s32.totalorder %s534_s24, 2  ;;  %v352_v29 = vld [vmem:[#allocation4] sm:$0xff]  ;;  %v353_v44 = vld [vmem:[#allocation4 + $0x8] sm:$0xff]  ;;  %s621_s26 = sshll.u32 %s700_s12, 4  ;;  %s622_s26 = int_to_ptr.vmem [resolvable:$false] %s621_s26 }
  0x1a   : > { %s623_s27 = scalar_lea.vmem %s622_s26, 256  ;;  %p624_p2 = scmp.lt.s32.totalorder %s808_s8, %s622_s26 }
  0x1b   : > { %s871_s24 = smov (!%p243_p12, %s534_s24), 2 }
  0x1c   : > { %s535_s25 = sshll.u32 %s871_s24, 3  ;;  %s430_s24 = scalar_lea.sflag [#allocation7], %s232_s5 }
  0x1d   : > { %s249_s28 = scalar_lea.vmem %s858_s0, %s535_s25  ;;  %s269_s3 = scalar_lea.vmem %s859_s1, %s535_s25 }
  0x1e   : > { %v297_v1 = vld [vmem:[%s249_s28] sm:$0xff]  ;;  %v298_v2 = vld [vmem:[%s249_s28 + $0x8] sm:$0xff]  ;;  %s617_s25 = scalar_lea.vmem %s808_s8, 128 }
  0x1f   : > { %309 = vmax.xlane.f32.xlu0 %v297_v1  ;;  %v787_v5 = vld [vmem:[%s269_s3] sm:$0xff]  ;;  %v792_v14 = vld [vmem:[%s269_s3 + $0x8] sm:$0xff]  ;;  %p618_p13 = scmp.ne.s32.totalorder %s808_s8, %s617_s25  ;;  %p625_p3 = scmp.lt.s32.totalorder %s623_s27, %s617_s25 }
  0x20   : > { %vm399_vm4 = vcmp.ne.s32.totalorder %v787_v5, 0  ;;  %vm400_vm7 = vcmp.ne.s32.totalorder %v792_v14, 0 }
  0x21   : > { %vm401_vm5 = vmand %vm399_vm4, %vm383_vm3  ;;  %p619_p0 = pnand %p618_p13, %p756_p4  ;;  %p626_p5 = por %p625_p3, %p624_p2 }
  0x22   : > { %vm402_vm8 = vmand %vm400_vm7, %vm384_vm6 }
  0x23   : > { %311 = vmax.xlane.f32.xlu0 %v298_v2  ;;  %p620_p1 = pneg %p619_p0 }
  0x25   : > { %p627_p6 = pnand %p626_p5, %p620_p1 }
  0x39   : > { %355 = vperm.xlu0 %604, %v787_v5   ;;  %v404_v5 = vld [vmem:[#allocation5 + $0x8] sm:$0xff] }
  0xac   : > { %v310_v7 = vpop.xlane.xlu0 %309 }
  0xad   : > { %v313_v8 = vmax.f32 %v307_v6, %v310_v7 }
  0xaf   : > { %v315_v10 = vsub.f32 %v307_v6, %v313_v8  ;;  %350 = vst.msk [vmem:[#allocation2] sm:$0xff] %vm284_vm0, %v313_v8  ;;  %327 = vperm.xlu1 %603, %v313_v8  }
  0xb0   : > { %v312_v11 = vpop.xlane.xlu0 %311 }
  0xb1   : > { %v314_v12 = vmax.f32 %v308_v9, %v312_v11  ;;  %v317_v32 = vmul.f32 1.442695, %v315_v10 }
  0xb3   : > { %v316_v13 = vsub.f32 %v308_v9, %v314_v12  ;;  %351 = vst.msk [vmem:[#allocation2 + $0x8] sm:$0xff] %vm284_vm0, %v314_v12  ;;  %332 = vperm.xlu1 %603, %v314_v12  }
  0xb5   : > { %v319_v33 = vmul.f32 1.442695, %v316_v13 }
  0xb6   : > { %v391_v56 = vld [vmem:[#allocation2] sm:$0xff] }
  0xb7   : > { %358 = vperm.xlu1 %603, %v792_v14  }
  0xb8   : > { %v356_v17 = vpop.permute.xlu0 %355 }
  0xb9   : > { %vm360_vm1 = vcmp.eq.s32.totalorder %v302_v16, %v356_v17 }
  0xba   : > { %v362_v18 = vsel %vm360_vm1, %v297_v1, 0.0  ;;  %v392_v63 = vld [vmem:[#allocation2 + $0x8] sm:$0xff] }
  0xbb   : > { %364 = vadd.xlane.f32.xlu0 %v362_v18 }
 0x12e   : > { %v328_v19 = vpop.permute.xlu1 %327 }
 0x12f   : > { %v335_v20 = vsub.f32 %v297_v1, %v328_v19 }
 0x131   : > { %v337_v21 = vmul.f32 1.442695, %v335_v20 }
 0x132   : > { %v333_v22 = vpop.permute.xlu1 %332 }
 0x133   : > { %605 = vpow2.f32 %v337_v21  ;;  %v336_v23 = vsub.f32 %v298_v2, %v333_v22 }
 0x135   : > { %v339_v24 = vmul.f32 1.442695, %v336_v23 }
 0x136   : > { %v359_v26 = vpop.permute.xlu1 %358 }
 0x137   : > { %607 = vpow2.f32 %v339_v24  ;;  %vm361_vm2 = vcmp.eq.s32.totalorder %v302_v16, %v359_v26 }
 0x138   : > { %v363_v28 = vsel %vm361_vm2, %v298_v2, 0.0  ;;  %609 = vpow2.f32 %v317_v32 }
 0x139   : > { %611 = vpow2.f32 %v319_v33 }
 0x13d   : > { %v606_v25 = vpop.eup %605 }
 0x13e   : > { %341 = vadd.xlane.f32.xlu1 %v606_v25 }
 0x141   : > { %v608_v27 = vpop.eup %607 }
 0x142   : > { %343 = vadd.xlane.f32.xlu1 %v608_v27  ;;  %v610_v34 = vpop.eup %609 }
 0x143   : > { %v323_v36 = vmul.f32 %v610_v34, %v321_v35  ;;  %v612_v37 = vpop.eup %611 }
 0x144   : > { %v324_v41 = vmul.f32 %v612_v37, %v322_v39 }
 0x146   : > { %366 = vadd.xlane.f32.xlu1 %v363_v28 }
 0x148   : > { %v365_v30 = vpop.xlane.xlu0 %364 }
 0x149   : > { %v368_v31 = vadd.f32 %v365_v30, %v352_v29 }
 0x14b   : > { %370 = vst.msk [vmem:[#allocation4] sm:$0xff] %vm284_vm0, %v368_v31 }
 0x152   : > { %v395_v57 = vld [vmem:[#allocation4] sm:$0xff] }
 0x1cb   : > { %v342_v38 = vpop.xlane.xlu1 %341 }
 0x1cc   : > { %v345_v40 = vadd.f32 %v342_v38, %v323_v36 }
 0x1ce   : > { %348 = vst.msk [vmem:[#allocation3] sm:$0xff] %vm284_vm0, %v345_v40 }
 0x1cf   : > { %v344_v42 = vpop.xlane.xlu1 %343 }
 0x1d0   : > { %v346_v43 = vadd.f32 %v344_v42, %v324_v41 }
 0x1d2   : > { %349 = vst.msk [vmem:[#allocation3 + $0x8] sm:$0xff] %vm284_vm0, %v346_v43 }
 0x1d3   : > { %v367_v45 = vpop.xlane.xlu1 %366 }
 0x1d4   : > { %v369_v46 = vadd.f32 %v367_v45, %v353_v44 }
 0x1d5   : > { %v385_v47 = vld [vmem:[#allocation3] sm:$0xff] }
 0x1d6   : > { %613 = vlog2.f32 %v385_v47  ;;  %371 = vst.msk [vmem:[#allocation4 + $0x8] sm:$0xff] %vm284_vm0, %v369_v46 }
 0x1d9   : > { %v386_v49 = vld [vmem:[#allocation3 + $0x8] sm:$0xff] }
 0x1da   : > { %615 = vlog2.f32 %v386_v49 }
 0x1dd   : > { %v396_v2 = vld [vmem:[#allocation4 + $0x8] sm:$0xff] }
 0x1e0   : > { %v614_v53 = vpop.eup %613 }
 0x1e1   : > { %v388_v55 = vmul.f32 0.6931472, %v614_v53 }
 0x1e3   : > { %v393_v58 = vadd.f32 %v391_v56, %v388_v55 }
 0x1e4   : > { %v616_v59 = vpop.eup %615 }
 0x1e5   : > { %v390_v60 = vmul.f32 0.6931472, %v616_v59  ;;  %v397_v61 = vsub.f32 %v393_v58, %v395_v57 }
 0x1e7   : > { %v394_v0 = vadd.f32 %v392_v63, %v390_v60  ;;  %v405_v1 = vsel %vm401_vm5, %v397_v61, 0.0 }
 0x1e8   : > { %v407_v3 = vadd.f32 %v405_v1, %v403_v62 }
 0x1e9   : > { %v398_v4 = vsub.f32 %v394_v0, %v396_v2 }
 0x1ea   : > { %409 = vst.msk [vmem:[#allocation5] sm:$0xff] %vm284_vm0, %v407_v3 }
 0x1eb   : > { %v406_v6 = vsel %vm402_vm8, %v398_v4, 0.0 }
 0x1ec   : > { %v408_v7 = vadd.f32 %v406_v6, %v404_v5 }
 0x1ee   : > { %410 = vst.msk [vmem:[#allocation5 + $0x8] sm:$0xff] %vm284_vm0, %v408_v7 }
 0x1f1   : > { %v413_v8 = vld [vmem:[#allocation5] sm:$0xff] }
 0x1f2   : > { %v415_v10 = vsel %vm284_vm0, %v413_v8, 0.0 }
 0x1f5   : > { %v414_v9 = vld [vmem:[#allocation5 + $0x8] sm:$0xff] }
 0x1f6   : > { %v416_v11 = vsel %vm284_vm0, %v414_v9, 0.0 }
 0x1f7   : > { %v417_v12 = vadd.f32 %v416_v11, %v415_v10 }
 0x1f9   : > { %418 = vadd.xlane.f32.xlu1 %v417_v12 }
 0x286   : > { %v419_v13 = vpop.xlane.xlu1 %418 }
 0x287   : > { %v420_v14 = vrot.slane %v419_v13, 4 }
 0x289   : > { %v421_v15 = vadd.f32 %v420_v14, %v419_v13 }
 0x28b   : > { %v422_v16 = vrot.slane %v421_v15, 2 }
 0x28d   : > { %v423_v17 = vadd.f32 %v422_v16, %v421_v15 }
 0x28f   : > { %v424_v18 = vrot.slane %v423_v17, 1 }
 0x291   : > { %v425_v19 = vadd.f32 %v424_v18, %v423_v17 }
 0x293   : > { %543 = vpush %v425_v19 }
 0x2c4   : > { %s544_s16 = spop %543 }
 0x2c5   : > { %v427_v20 = vstv %s544_s16 }
 0x2c6   : > { %428 = vst [vmem:[%s234_s7] sm:$0xff] %v427_v20 }
 0x2c7   : > { %630 = shalt.err (!%p627_p6)
}
 0x2c8   : > { %s631_s28 = scalar_lea.hbm %s813_s23, 128  ;;  %s635_s3 = scalar_lea.hbm %s860_s2, 256 }
 0x2c9   : > { %p632_p7 = scmp.ne.s32.totalorder %s813_s23, %s631_s28  ;;  %p636_p11 = scmp.lt.u32.totalorder %s813_s23, %s860_s2 }
 0x2ca   : > { %p637_p12 = scmp.lt.u32.totalorder %s635_s3, %s631_s28  ;;  %p639_p0 = scmp.lt.u32.totalorder %s631_s28, %s813_s23 }
 0x2cb   : > { %p633_p9 = pnand %p632_p7, %p756_p4 }
 0x2cc   : > { %p638_p13 = por %p637_p12, %p636_p11 }
 0x2cd   : > { %p634_p10 = pneg %p633_p9 }
 0x2ce   : > { %p640_p1 = por %p639_p0, %p638_p13 }
 0x2d0   : > { %p641_p2 = pnand %p640_p1, %p634_p10 }
 0x2d2   : > { %644 = shalt.err (!%p641_p2)
}
 0x2d3   : > { %545 = dma.vmem_to_hbm [thread:$0]  (%p756_p4), %s808_s8, 128, %s813_s23, %s430_s24  }
 0x2d4 PF: > { %p551_p3 = scmp.ge.s32.totalorder %s695_s14, 2  ;;  %s455_s6 = sand.u32 1, %s675_s9  }
 0x2d5   : > { %s456_s7 = scalar_lea.sflag [#allocation7], %s455_s6 }
 0x2d6   : > { %p548_p5 = pnand %p551_p3, %p763_p8 }
 0x2d8   : > { %670 = dma.done.wait (!%p548_p5), %s456_s7, 128  }
 0x2d9   : > { %672 = vsyncadd (!%p548_p5), %s456_s7, 4294967168  ;;  %s15_s14 = sadd.s32 1, %s695_s14   ;;  %s863_s9 = smov %s679_s10 }
 0x2da   : > { %p12_p6 = scmp.ge.s32.totalorder %s15_s14, 4   ;;  %s864_s10 = smov %s683_s11 }
 0x2db   : > { %s865_s11 = smov %s769_s22  ;;  %s866_s12 = smov %s691_s13 }
 0x2dc   : > { %s867_s13 = smov %s869_s17  ;;  %14 = sbr.rel (!%p12_p6) target bundleno = 4 (0x4), region = 82 }
 0x2e3   :  { %461 = vsyncpa [#allocation7], 1 }
 0x2e4   :  { %463 = vsyncpa [#allocation7 + $0x1], 1 }

</bundles_post_ra>
